<compile_context>
chip_gen: v5e
topology: v5e:2x2
jax: 0.10.0
libtpu: 0.0.40
codegen_flags: <defaults>
</compile_context>

<pallas_src>
import functools

import numpy as np
import jax
import jax.numpy as jnp
from jax.experimental import pallas as pl
from jax.experimental.pallas import tpu as pltpu

EPS = 1e-10   # AdvSpatialEdge.eps


# ---------------------------------------------------------------------------
# Pallas kernel: dense spatial relation matrix (one (TI, TJ) tile per step)
# ---------------------------------------------------------------------------
def _spatial_rel_kernel(lhs_ref, rhsT_ref, meta_ref, metaT_ref, rel_ref, *,
                        radius, min_distance, max_distance, across_res_mask):
    # d2[i, j] = |p_i|^2 + |p_j|^2 - 2 p_i . p_j   via one MXU matmul (K = 8).
    d2 = jnp.dot(lhs_ref[...], rhsT_ref[...],
                 preferred_element_type=jnp.float32)            # (TI, TJ) f32

    g_row = meta_ref[:, 0:1]        # (TI, 1) node2graph
    r_row = meta_ref[:, 1:2]        # (TI, 1) bead2residue
    i_row = meta_ref[:, 2:3]        # (TI, 1) node index
    g_col = metaT_ref[0:1, :]       # (1, TJ)
    r_col = metaT_ref[1:2, :]
    i_col = metaT_ref[2:3, :]

    resdiff = jnp.abs(r_row - r_col)                            # (TI, TJ) i32

    valid = ((g_row == g_col) & (i_row != i_col)
             & (d2 < jnp.float32(radius * radius)))             # radius_graph
    if min_distance > 0:            # drop |res_i - res_j| < min_distance
        valid &= resdiff >= jnp.int32(min_distance)
    if max_distance:                # drop |res_i - res_j| > max_distance
        valid &= resdiff <= jnp.int32(max_distance)

    if across_res_mask:             # relation 1 across residues, else 0
        rel = jnp.where(resdiff > 0, 1, 0)
    else:
        rel = jnp.zeros_like(resdiff)

    rel_ref[...] = jnp.where(valid, rel, -1).astype(jnp.int8)


# ---------------------------------------------------------------------------
# Wrapper: tiling / padding / pallas_call
# ---------------------------------------------------------------------------
def _round_up(x, m):
    return (x + m - 1) // m * m


def _pick_tile(n_pad, target):
    """Largest multiple of 128 that divides n_pad and is <= target."""
    t = max(128, min(target, n_pad) // 128 * 128)
    while n_pad % t:
        t -= 128
    return t


def spatial_relation_matrix(node_position, node2graph, bead2residue, *,
                            radius=5.0, min_distance=5, max_distance=None,
                            across_res_mask=True,
                            row_tile=256, col_tile=2048):
    """Dense int8 spatial relation matrix, padded to (N_pad, N_pad).

    rel[i, j] == -1 -> no spatial edge; otherwise the spatial relation code
    (0, or 1 for across-residue edges when across_res_mask).  The eps
    coincidence filter is NOT applied here (it is applied to the final sparse
    edge list, matching the torch module).  Padded rows/cols carry
    node2graph == -1 and must be sliced off by the caller ([:N, :N]).
    """
    pos = jnp.asarray(node_position, jnp.float32)
    n = pos.shape[0]
    n_pad = _round_up(n, 128)
    ti = _pick_tile(n_pad, row_tile)
    tj = _pick_tile(n_pad, col_tile)

    sq = jnp.sum(pos * pos, axis=1, keepdims=True)               # (N, 1)
    one = jnp.ones((n, 1), jnp.float32)
    zero3 = jnp.zeros((n, 3), jnp.float32)
    lhs = jnp.concatenate([pos, sq, one, zero3], axis=1)          # (N, 8)
    rhs = jnp.concatenate([-2.0 * pos, one, sq, zero3], axis=1)   # (N, 8)

    pad = n_pad - n
    lhs = jnp.pad(lhs, ((0, pad), (0, 0)))                        # (n_pad, 8)
    rhsT = jnp.pad(rhs, ((0, pad), (0, 0))).T                     # (8, n_pad)

    g = jnp.full((n_pad,), -1, jnp.int32).at[:n].set(jnp.asarray(node2graph, jnp.int32))
    r = jnp.zeros((n_pad,), jnp.int32).at[:n].set(jnp.asarray(bead2residue, jnp.int32))
    ids = jnp.arange(n_pad, dtype=jnp.int32)
    meta = jnp.stack([g, r, ids], axis=1)                         # (n_pad, 3)
    metaT = meta.T                                                # (3, n_pad)

    kernel = functools.partial(
        _spatial_rel_kernel, radius=float(radius),
        min_distance=int(min_distance), max_distance=max_distance,
        across_res_mask=bool(across_res_mask))

    rel = pl.pallas_call(
        kernel,
        out_shape=jax.ShapeDtypeStruct((n_pad, n_pad), jnp.int8),
        grid_spec=pltpu.PrefetchScalarGridSpec(
            num_scalar_prefetch=0,
            grid=(n_pad // ti, n_pad // tj),
            in_specs=[
                pl.BlockSpec((ti, 8), lambda i, j: (i, 0)),       # lhs row tile
                pl.BlockSpec((8, tj), lambda i, j: (0, j)),       # rhs^T col tile
                pl.BlockSpec((ti, 3), lambda i, j: (i, 0)),       # meta row tile
                pl.BlockSpec((3, tj), lambda i, j: (0, j)),       # meta^T col tile
            ],
            out_specs=pl.BlockSpec((ti, tj), lambda i, j: (i, j)),
        ),
        compiler_params=pltpu.CompilerParams(
            dimension_semantics=("parallel", "parallel"),
            vmem_limit_bytes=32 * 1024 * 1024,
        ),
    )(lhs, rhsT, meta, metaT)
    return rel


# ---------------------------------------------------------------------------
# Sparse glue (O(|E|)): cg edge enhance / reduce / eps filter, like the module
# ---------------------------------------------------------------------------
def _assemble_edge_list(rel_mat, node_position, cg_edge_list, *, n_nodes,
                        across_res_mask=True, cg_edge_enhance=True,
                        cg_edge_reduction=True):
    rel_np = np.asarray(rel_mat)[:n_nodes, :n_nodes]
    rows, cols = np.nonzero(rel_np >= 0)
    edges = np.stack([rows, cols, rel_np[rows, cols].astype(np.int64)],
                     axis=1).astype(np.int64)
    if cg_edge_enhance:
        off = 2 if across_res_mask else 1
        cg = np.asarray(cg_edge_list).astype(np.int64).copy()
        cg[:, 2] += off
        edges = np.concatenate([edges, cg], axis=0)
        if cg_edge_reduction:
            # unique (i, j) pairs sorted, keep minimum relation
            # (== torch unique(sorted=True) + scatter_min).
            order = np.lexsort((edges[:, 2], edges[:, 1], edges[:, 0]))
            edges = edges[order]
            keep = np.ones(len(edges), bool)
            if len(edges) > 1:
                keep[1:] = ((edges[1:, 0] != edges[:-1, 0]) |
                            (edges[1:, 1] != edges[:-1, 1]))
            edges = edges[keep]
        # TODO(synk): with cg_edge_reduction=False the torch output keeps
        # radius_graph's internal ordering and duplicate (i, j) pairs; here the
        # set of edges matches but the row order differs.
    # final eps mask (applied last, to spatial AND enhanced cg edges)
    if len(edges):
        pos = np.asarray(node_position, np.float64)
        d = np.linalg.norm(pos[edges[:, 0]] - pos[edges[:, 1]], axis=-1)
        edges = edges[d >= EPS]
    return edges


def adv_spatial_edge(node_position, node2graph, bead2residue, cg_edge_list, *,
                     radius=5.0, min_distance=5, max_distance=None,
                     max_num_neighbors=32, across_res_mask=True,
                     cg_edge_enhance=True, cg_edge_reduction=True,
                     row_tile=256, col_tile=2048):
    """Full AdvSpatialEdge.forward: returns (edge_list (|E|, 3) int64, num_relation)."""
    # TODO(synk): max_num_neighbors (radius_graph's per-node neighbor cap) is not
    #             enforced; it is a no-op whenever every node has <= max_num_neighbors
    #             in-radius neighbours.
    n = node_position.shape[0]
    rel = spatial_relation_matrix(
        node_position, node2graph, bead2residue, radius=radius,
        min_distance=min_distance, max_distance=max_distance,
        across_res_mask=across_res_mask, row_tile=row_tile, col_tile=col_tile)
    rel = jax.block_until_ready(rel)
    edges = _assemble_edge_list(
        rel, node_position, cg_edge_list, n_nodes=n,
        across_res_mask=across_res_mask, cg_edge_enhance=cg_edge_enhance,
        cg_edge_reduction=cg_edge_reduction)
    num_relation = 1 + (1 if across_res_mask else 0) + (5 if cg_edge_enhance else 0)
    return edges, num_relation


# ---------------------------------------------------------------------------
# Pure-numpy references (float64)
# ---------------------------------------------------------------------------
def _reference_spatial_rel(pos, n2g, b2r, *, radius, min_distance, max_distance,
                           across_res_mask):
    pos = np.asarray(pos, np.float64)
    n2g = np.asarray(n2g)
    b2r = np.asarray(b2r).astype(np.int64)
    n = pos.shape[0]
    d2 = ((pos[:, None, :] - pos[None, :, :]) ** 2).sum(-1)
    resdiff = np.abs(b2r[:, None] - b2r[None, :])
    valid = ((n2g[:, None] == n2g[None, :]) & (~np.eye(n, dtype=bool))
             & (d2 < radius * radius))
    if min_distance > 0:
        valid &= resdiff >= min_distance
    if max_distance:
        valid &= resdiff <= max_distance
    rel = (resdiff > 0).astype(np.int64) if across_res_mask else np.zeros((n, n), np.int64)
    return np.where(valid, rel, -1).astype(np.int8), d2


def _reference_forward(pos, n2g, b2r, cg_edges, *, radius, min_distance,
                       max_distance, across_res_mask, cg_edge_enhance,
                       cg_edge_reduction):
    rel, _ = _reference_spatial_rel(pos, n2g, b2r, radius=radius,
                                    min_distance=min_distance,
                                    max_distance=max_distance,
                                    across_res_mask=across_res_mask)
    rows, cols = np.nonzero(rel >= 0)
    edges = np.stack([rows, cols, rel[rows, cols].astype(np.int64)], 1).astype(np.int64)
    num_relation = 1 + (1 if across_res_mask else 0)
    if cg_edge_enhance:
        off = 2 if across_res_mask else 1
        cg = np.asarray(cg_edges).astype(np.int64).copy()
        cg[:, 2] += off
        edges = np.concatenate([edges, cg], 0)
        if cg_edge_reduction:
            best = {}
            for s, t, r in edges:
                k = (int(s), int(t))
                best[k] = min(best.get(k, 1 << 30), int(r))
            edges = np.array([[s, t, best[(s, t)]] for s, t in sorted(best)], np.int64)
        num_relation += 5
    p = np.asarray(pos, np.float64)
    if len(edges):
        d = np.linalg.norm(p[edges[:, 0]] - p[edges[:, 1]], axis=-1)
        edges = edges[d >= EPS]
    return edges, num_relation


# ---------------------------------------------------------------------------
if __name__ == "__main__":
    key = jax.random.PRNGKey(0)
    n_per_graph = 48
    n = 2 * n_per_graph                               # 96 nodes, padded to 128
    node_position = jax.random.uniform(key, (n, 3), jnp.float32) * 10.0
    # one exactly-coincident pair inside graph 0 -> exercises the eps filter
    node_position = node_position.at[40].set(node_position[10])
    node2graph = jnp.concatenate([jnp.zeros(n_per_graph, jnp.int32),
                                  jnp.ones(n_per_graph, jnp.int32)])
    bead2residue = jnp.arange(n, dtype=jnp.int32) // 2   # 2 beads per residue

    # synthetic original cg edge list: backbone i <-> i+1 within each graph
    src, dst, rels = [], [], []
    for g0 in (0, n_per_graph):
        for k in range(n_per_graph - 1):
            a, b = g0 + k, g0 + k + 1
            src += [a, b]; dst += [b, a]; rels += [k % 4, k % 4]
    cg_edge_list = jnp.stack([jnp.array(src, jnp.int32),
                              jnp.array(dst, jnp.int32),
                              jnp.array(rels, jnp.int32)], axis=1)

    params = dict(radius=5.0, min_distance=5, max_distance=None,
                  across_res_mask=True)

    # 1) dense spatial-relation matrix from the kernel vs float64 reference
    rel_mat = jax.block_until_ready(
        spatial_relation_matrix(node_position, node2graph, bead2residue, **params))
    ref_rel, ref_d2 = _reference_spatial_rel(node_position, node2graph,
                                             bead2residue, **params)
    got = np.asarray(rel_mat)[:n, :n]
    mism = got != ref_rel
    exact = not mism.any()
    if not exact:
        # MXU d2 may round pairs sitting essentially on the radius cutoff;
        # anything further from the cutoff must match exactly.
        d_ref = np.sqrt(ref_d2[mism])
        assert np.all(np.abs(d_ref - params["radius"]) < 5e-2), \
            "kernel relation matrix mismatch beyond radius-cutoff rounding"

    # 2) full forward (edge list + num_relation) vs torch-semantics reference
    edge_list, num_relation = adv_spatial_edge(
        node_position, node2graph, bead2residue, cg_edge_list,
        cg_edge_enhance=True, cg_edge_reduction=True, **params)
    ref_edges, ref_num_relation = _reference_forward(
        node_position, node2graph, bead2residue, cg_edge_list,
        cg_edge_enhance=True, cg_edge_reduction=True, **params)

    assert num_relation == ref_num_relation == 7
    if exact:
        assert np.array_equal(edge_list, ref_edges), "edge list mismatch"
    assert edge_list.shape[0] > 0
    pairs = set(map(tuple, edge_list[:, :2].tolist()))
    assert (10, 40) not in pairs and (40, 10) not in pairs, "eps filter failed"

    print("KERNEL_OK")
</pallas_src>

<mosaic_0001>
module attributes {stable_mosaic.version = 11 : i64} {
  func.func @_spatial_rel_kernel(%arg0: i32, %arg1: i32, %arg2: memref<128x8xf32, #tpu.memory_space<vmem>>, %arg3: memref<8x128xf32, #tpu.memory_space<vmem>>, %arg4: memref<128x3xi32, #tpu.memory_space<vmem>>, %arg5: memref<3x128xi32, #tpu.memory_space<vmem>>, %arg6: memref<128x128xi8, #tpu.memory_space<vmem>>) attributes {dimension_semantics = [#tpu.dimension_semantics<parallel>, #tpu.dimension_semantics<parallel>], iteration_bounds = array<i64: 1, 1>, scalar_prefetch = 0 : i64, scratch_operands = 0 : i64, tpu.core_type = #tpu.core_type<tc>, window_params = [{transform_indices = @transform_0, window_bounds = array<i64: 128, 8>}, {transform_indices = @transform_1, window_bounds = array<i64: 8, 128>}, {transform_indices = @transform_2, window_bounds = array<i64: 128, 3>}, {transform_indices = @transform_3, window_bounds = array<i64: 3, 128>}, {transform_indices = @transform_4, window_bounds = array<i64: 128, 128>}]} {
    %c0 = arith.constant 0 : index
    %c0_0 = arith.constant 0 : index
    %0 = vector.load %arg2[%c0, %c0_0] : memref<128x8xf32, #tpu.memory_space<vmem>>, vector<128x8xf32>
    %c0_1 = arith.constant 0 : index
    %c0_2 = arith.constant 0 : index
    %1 = vector.load %arg3[%c0_1, %c0_2] : memref<8x128xf32, #tpu.memory_space<vmem>>, vector<8x128xf32>
    %cst = arith.constant dense<0.000000e+00> : vector<128x128xf32>
    %2 = tpu.matmul %0, %1, %cst {dimension_numbers = #tpu.dot_dimension_numbers<[1], [0], [0], [1], [0, 0, 1, 1], [], []>} : vector<128x8xf32>, vector<8x128xf32>, vector<128x128xf32> -> vector<128x128xf32>
    %c0_3 = arith.constant 0 : index
    %c0_4 = arith.constant 0 : index
    %3 = vector.load %arg4[%c0_3, %c0_4] : memref<128x3xi32, #tpu.memory_space<vmem>>, vector<128x1xi32>
    %c0_5 = arith.constant 0 : index
    %c1 = arith.constant 1 : index
    %4 = vector.load %arg4[%c0_5, %c1] : memref<128x3xi32, #tpu.memory_space<vmem>>, vector<128x1xi32>
    %c0_6 = arith.constant 0 : index
    %c2 = arith.constant 2 : index
    %5 = vector.load %arg4[%c0_6, %c2] : memref<128x3xi32, #tpu.memory_space<vmem>>, vector<128x1xi32>
    %c0_7 = arith.constant 0 : index
    %c0_8 = arith.constant 0 : index
    %6 = vector.load %arg5[%c0_7, %c0_8] : memref<3x128xi32, #tpu.memory_space<vmem>>, vector<1x128xi32>
    %c1_9 = arith.constant 1 : index
    %c0_10 = arith.constant 0 : index
    %7 = vector.load %arg5[%c1_9, %c0_10] : memref<3x128xi32, #tpu.memory_space<vmem>>, vector<1x128xi32>
    %c2_11 = arith.constant 2 : index
    %c0_12 = arith.constant 0 : index
    %8 = vector.load %arg5[%c2_11, %c0_12] : memref<3x128xi32, #tpu.memory_space<vmem>>, vector<1x128xi32>
    %9 = vector.broadcast %4 : vector<128x1xi32> to vector<128x128xi32>
    %10 = vector.broadcast %7 : vector<1x128xi32> to vector<128x128xi32>
    %11 = arith.subi %9, %10 : vector<128x128xi32>
    %12 = math.absi %11 : vector<128x128xi32>
    %13 = vector.broadcast %3 : vector<128x1xi32> to vector<128x128xi32>
    %14 = vector.broadcast %6 : vector<1x128xi32> to vector<128x128xi32>
    %15 = arith.cmpi eq, %13, %14 : vector<128x128xi32>
    %16 = vector.broadcast %5 : vector<128x1xi32> to vector<128x128xi32>
    %17 = vector.broadcast %8 : vector<1x128xi32> to vector<128x128xi32>
    %18 = arith.cmpi ne, %16, %17 : vector<128x128xi32>
    %19 = arith.andi %15, %18 : vector<128x128xi1>
    %cst_13 = arith.constant 2.500000e+01 : f32
    %20 = vector.broadcast %cst_13 : f32 to vector<128x128xf32>
    %21 = arith.cmpf olt, %2, %20 : vector<128x128xf32>
    %22 = arith.andi %19, %21 : vector<128x128xi1>
    %c5_i32 = arith.constant 5 : i32
    %23 = vector.broadcast %c5_i32 : i32 to vector<128x128xi32>
    %24 = arith.cmpi sge, %12, %23 : vector<128x128xi32>
    %25 = arith.andi %22, %24 : vector<128x128xi1>
    %c0_i32 = arith.constant 0 : i32
    %26 = vector.broadcast %c0_i32 : i32 to vector<128x128xi32>
    %27 = arith.cmpi sgt, %12, %26 : vector<128x128xi32>
    %c1_i32 = arith.constant 1 : i32
    %c0_i32_14 = arith.constant 0 : i32
    %28 = vector.broadcast %c1_i32 : i32 to vector<128x128xi32>
    %29 = vector.broadcast %c0_i32_14 : i32 to vector<128x128xi32>
    %30 = arith.select %27, %28, %29 : vector<128x128xi1>, vector<128x128xi32>
    %c-1_i32 = arith.constant -1 : i32
    %31 = vector.broadcast %c-1_i32 : i32 to vector<128x128xi32>
    %32 = arith.select %25, %30, %31 : vector<128x128xi1>, vector<128x128xi32>
    %33 = arith.trunci %32 : vector<128x128xi32> to vector<128x128xi8>
    %c0_15 = arith.constant 0 : index
    %c0_16 = arith.constant 0 : index
    %34 = vector.load %arg6[%c0_15, %c0_16] : memref<128x128xi8, #tpu.memory_space<vmem>>, vector<128x128xi8>
    tpu.vector_store %arg6[%c0_15, %c0_16], %33 {strides = array<i32>} : memref<128x128xi8, #tpu.memory_space<vmem>>, vector<128x128xi8>,
    return
  }
  func.func @transform_0(%arg0: i32, %arg1: i32) -> (i32, i32) {
    %c0_i32 = arith.constant 0 : i32
    %c0_i32_0 = arith.constant 0 : i32
    return %arg0, %c0_i32 : i32, i32
  }
  func.func @transform_1(%arg0: i32, %arg1: i32) -> (i32, i32) {
    %c0_i32 = arith.constant 0 : i32
    %c0_i32_0 = arith.constant 0 : i32
    return %c0_i32, %arg1 : i32, i32
  }
  func.func @transform_2(%arg0: i32, %arg1: i32) -> (i32, i32) {
    %c0_i32 = arith.constant 0 : i32
    %c0_i32_0 = arith.constant 0 : i32
    return %arg0, %c0_i32 : i32, i32
  }
  func.func @transform_3(%arg0: i32, %arg1: i32) -> (i32, i32) {
    %c0_i32 = arith.constant 0 : i32
    %c0_i32_0 = arith.constant 0 : i32
    return %c0_i32, %arg1 : i32, i32
  }
  func.func @transform_4(%arg0: i32, %arg1: i32) -> (i32, i32) {
    %c0_i32 = arith.constant 0 : i32
    return %arg0, %arg1 : i32, i32
  }
}

</mosaic_0001>

<bundles_post_ra>
// kernel: tpu_custom_call.1
= control target key start
LH: loop header
LB: loop body
LE: loop exit
PB: predicated region body
PF: predicated region fallthrough
CT: control target
= control target key end

     0   :  { %v636_v3 = vmov 1   ;;  %s1244_s0 = inlined_call_operand.vmem [shape: f32[128,8], index: 0, kind: input, shape index: {}]   ;;  %s1245_s1 = inlined_call_operand.vmem [shape: f32[8,128], index: 1, kind: input, shape index: {}]   ;;  %s1246_s2 = inlined_call_operand.vmem [shape: s32[128,3], index: 2, kind: input, shape index: {}]   ;;  %s1247_s3 = inlined_call_operand.vmem [shape: s32[3,128], index: 3, kind: input, shape index: {}]   ;;  %s1248_s4 = inlined_call_operand.hbm [shape: s8[128,128], index: 4, kind: output, shape index: {}]  }
   0x1   :  { %v670_v0 = vld [vmem:[%s1246_s2 + $0x20] sm:$0xff]  ;;  %v675_v1 = vld [vmem:[%s1246_s2 + $0x10] sm:$0xff]  ;;  %600 = vset.pattern.permute.xlu2 %v636_v3  ;;  %599 = vset.pattern.permute.xlu1 %v636_v3 }
   0x2   :  { %v680_v2 = vld [vmem:[%s1246_s2] sm:$0xff]  ;;  %598 = vset.pattern.permute.xlu0 %v636_v3  ;;  %181 = vperm.xlu2 %600, %v670_v0  }
   0x3   :  { %175 = vperm.xlu1 %599, %v675_v1   ;;  %169 = vperm.xlu0 %598, %v680_v2   ;;  %v34_v4 = vld [vmem:[%s1245_s1] sm:$0xff] }
   0x4   :  { %99 = vmatpush.msra.mxu0 %v34_v4  ;;  %589 = vmatpush.msra.mxu1 %v34_v4 }
   0x5   :  { %9 = vsyncpa [#allocation3], 0  ;;  %v691_v5 = vld [vmem:[%s1246_s2 + $0x28] sm:$0xff]  ;;  %590 = vmatpush.msra.mxu2 %v34_v4  ;;  %591 = vmatpush.msra.mxu3 %v34_v4  ;;  %v696_v6 = vld [vmem:[%s1246_s2 + $0x18] sm:$0xff]  ;;  %vm35_vm0 = vcmask 64512   ;;  %v637_v26 = vmov 0  }
   0x6   :  { %v701_v7 = vld [vmem:[%s1246_s2 + $0x8] sm:$0xff]  ;;  %v18_v8 = vld [vmem:[%s1244_s0] sm:$0xff]  ;;  %v718_v10 = vld [vmem:[%s1246_s2 + $0x38] sm:$0xff]  ;;  %v638_v34 = vmov 2   ;;  %s561_s7 = sshll.u32 %s1248_s4, 4  ;;  %s640_s8 = smov 128   ;;  %s562_s7 = int_to_ptr.hbm [resolvable:$true] %s561_s7 }
   0x7   :  { %573 = vmatmul.msk.f32.vlgmr.msra.gmra.mxu0 %vm35_vm0, %v18_v8  ;;  %v713_v9 = vld [vmem:[%s1246_s2 + $0x40] sm:$0xff]  ;;  %v723_v11 = vld [vmem:[%s1246_s2 + $0x30] sm:$0xff]  ;;  %v19_v12 = vld [vmem:[%s1244_s0 + $0x8] sm:$0xff]  ;;  %s641_s9 = smov 8  }
   0x8   :  { %v22_v13 = vld [vmem:[%s1244_s0 + $0x20] sm:$0xff]  ;;  %v739_v14 = vld [vmem:[%s1246_s2 + $0x58] sm:$0xff]  ;;  %v744_v15 = vld [vmem:[%s1246_s2 + $0x50] sm:$0xff] }
   0x9   :  { %577 = vmatmul.msk.f32.vlgmr.msra.gmra.mxu1 %vm35_vm0, %v22_v13  ;;  %v749_v16 = vld [vmem:[%s1246_s2 + $0x48] sm:$0xff]  ;;  %v20_v17 = vld [vmem:[%s1244_s0 + $0x10] sm:$0xff]  ;;  %v26_v19 = vld [vmem:[%s1244_s0 + $0x40] sm:$0xff] }
   0xa   :  { %184 = vperm.xlu2 %600, %v691_v5   ;;  %v23_v18 = vld [vmem:[%s1244_s0 + $0x28] sm:$0xff]  ;;  %581 = vmatmul.msk.f32.vlgmr.msra.gmra.mxu2 %vm35_vm0, %v26_v19  ;;  %v769_v20 = vld [vmem:[%s1246_s2 + $0x70] sm:$0xff]  ;;  %v779_v22 = vld [vmem:[%s1246_s2 + $0x60] sm:$0xff] }
   0xb   :  { %178 = vperm.xlu1 %599, %v696_v6   ;;  %172 = vperm.xlu0 %598, %v701_v7   ;;  %v774_v21 = vld [vmem:[%s1246_s2 + $0x68] sm:$0xff]  ;;  %v24_v23 = vld [vmem:[%s1244_s0 + $0x30] sm:$0xff]  ;;  %v795_v25 = vld [vmem:[%s1246_s2 + $0x78] sm:$0xff] }
   0xc   :  { %v27_v24 = vld [vmem:[%s1244_s0 + $0x48] sm:$0xff]  ;;  %v25_v27 = vld [vmem:[%s1244_s0 + $0x38] sm:$0xff]  ;;  %v28_v28 = vld [vmem:[%s1244_s0 + $0x50] sm:$0xff] }
   0xd   :  { %v30_v29 = vld [vmem:[%s1244_s0 + $0x60] sm:$0xff]  ;;  %v31_v30 = vld [vmem:[%s1244_s0 + $0x68] sm:$0xff]  ;;  %v21_v31 = vld [vmem:[%s1244_s0 + $0x18] sm:$0xff] }
   0xe   :  { %585 = vmatmul.msk.f32.vlgmr.msra.gmra.mxu3 %vm35_vm0, %v30_v29  ;;  %v29_v32 = vld [vmem:[%s1244_s0 + $0x58] sm:$0xff]  ;;  %v32_v33 = vld [vmem:[%s1244_s0 + $0x70] sm:$0xff]  ;;  %v910_v4 = vld [vmem:[%s1247_s3 + $0x1] ss:$0 sm:$0xff] }
   0xf   :  { %574 = vmatmul.msk.f32.gmra.mxu0 %vm35_vm0, %v19_v12  ;;  %v33_v35 = vld [vmem:[%s1244_s0 + $0x78] sm:$0xff]  ;;  %v926_v12 = vld [vmem:[%s1247_s3 + $0x2] ss:$0 sm:$0xff] }
  0x11   :  { %578 = vmatmul.msk.f32.gmra.mxu1 %vm35_vm0, %v23_v18 }
  0x12   :  { %193 = vperm.xlu2 %600, %v713_v9   ;;  %582 = vmatmul.msk.f32.gmra.mxu2 %vm35_vm0, %v27_v24 }
  0x13   :  { %190 = vperm.xlu1 %599, %v718_v10   ;;  %187 = vperm.xlu0 %598, %v723_v11  }
  0x16   :  { %586 = vmatmul.msk.f32.gmra.mxu3 %vm35_vm0, %v31_v30 }
  0x17   :  { %575 = vmatmul.msk.f32.gmra.mxu0 %vm35_vm0, %v20_v17 }
  0x19   :  { %579 = vmatmul.msk.f32.gmra.mxu1 %vm35_vm0, %v24_v23 }
  0x1a   :  { %202 = vperm.xlu2 %600, %v739_v14   ;;  %583 = vmatmul.msk.f32.gmra.mxu2 %vm35_vm0, %v28_v28 }
  0x1b   :  { %199 = vperm.xlu1 %599, %v744_v15   ;;  %196 = vperm.xlu0 %598, %v749_v16  }
  0x1e   :  { %587 = vmatmul.msk.f32.gmra.mxu3 %vm35_vm0, %v32_v33 }
  0x1f   :  { %576 = vmatmul.msk.f32.gmra.mxu0 %vm35_vm0, %v21_v31 }
  0x21   :  { %580 = vmatmul.msk.f32.gmra.mxu1 %vm35_vm0, %v25_v27 }
  0x22   :  { %211 = vperm.xlu2 %600, %v769_v20   ;;  %584 = vmatmul.msk.f32.gmra.mxu2 %vm35_vm0, %v29_v32 }
  0x23   :  { %208 = vperm.xlu1 %599, %v774_v21   ;;  %205 = vperm.xlu0 %598, %v779_v22  }
  0x26   :  { %588 = vmatmul.msk.f32.gmra.mxu3 %vm35_vm0, %v33_v35 }
  0x2a   :  { %602 = vset.pattern.permute.xlu2 %v637_v26 }
  0x2b   :  { %601 = vset.pattern.permute.xlu1 %v637_v26  ;;  %214 = vperm.xlu0 %598, %v795_v25  }
  0x2c   :  { %285 = vperm.xlu2 %602, %v701_v7   ;;  %282 = vperm.xlu1 %601, %v680_v2  }
  0x33   :  { %603 = vset.pattern.permute.xlu0 %v637_v26 }
  0x34   :  { %294 = vperm.xlu2 %602, %v670_v0   ;;  %291 = vperm.xlu1 %601, %v696_v6  }
  0x35   :  { %288 = vperm.xlu0 %603, %v675_v1  }
  0x3c   :  { %300 = vperm.xlu2 %602, %v723_v11   ;;  %297 = vperm.xlu1 %601, %v691_v5  }
  0x3d   :  { %303 = vperm.xlu0 %603, %v718_v10  }
  0x44   :  { %309 = vperm.xlu2 %602, %v749_v16   ;;  %306 = vperm.xlu1 %601, %v713_v9  }
  0x45   :  { %312 = vperm.xlu0 %603, %v744_v15  }
  0x4c   :  { %318 = vperm.xlu2 %602, %v779_v22   ;;  %315 = vperm.xlu1 %601, %v739_v14  }
  0x4d   :  { %321 = vperm.xlu0 %603, %v774_v21  }
  0x54   :  { %327 = vperm.xlu2 %602, %v795_v25   ;;  %324 = vperm.xlu1 %601, %v769_v20  }
  0x55   :  { %604 = vset.pattern.permute.xlu0 %v638_v34 }
  0x56   :  { %347 = vperm.xlu0 %604, %v680_v2  }
  0x5c   :  { %606 = vset.pattern.permute.xlu2 %v638_v34  ;;  %605 = vset.pattern.permute.xlu1 %v638_v34  ;;  %v182_v36 = vpop.permute.xlu2 %181 }
  0x5d   :  { %353 = vperm.xlu2 %606, %v675_v1   ;;  %350 = vperm.xlu1 %605, %v701_v7   ;;  %v221_v8 = vsub.s32 %v182_v36, %v910_v4 }
  0x5e   :  { %362 = vperm.xlu0 %604, %v691_v5  }
  0x5f   :  { %v246_v13 = vsub.s32 0, %v221_v8  ;;  %vm245_vm1 = vcmp.lt.s32.totalorder %v221_v8, 0 }
  0x61   :  { %v247_v19 = vsel %vm245_vm1, %v246_v13, %v221_v8 }
  0x62   :  { %vm495_vm13 = vcmp.gt.s32.totalorder %v247_v19, 0 }
  0x63   :  { %v976_v36 = vsel %vm495_vm13, 1, %v637_v26 }
  0x64   :  { %v185_v37 = vpop.permute.xlu2 %184 }
  0x65   :  { %359 = vperm.xlu2 %606, %v670_v0   ;;  %356 = vperm.xlu1 %605, %v696_v6  }
  0x66   :  { %371 = vperm.xlu0 %604, %v713_v9  }
  0x6c   :  { %v856_v38 = vpop.permute.xlu2 %193 }
  0x6d   :  { %368 = vperm.xlu2 %606, %v718_v10   ;;  %365 = vperm.xlu1 %605, %v723_v11  }
  0x6e   :  { %380 = vperm.xlu0 %604, %v739_v14   ;;  %v222_v14 = vsub.s32 %v185_v37, %v910_v4 }
  0x70   :  { %vm248_vm6 = vcmp.lt.s32.totalorder %v222_v14, 0 }
  0x74   :  { %v861_v39 = vpop.permute.xlu2 %202 }
  0x75   :  { %v176_v40 = vpop.permute.xlu1 %175  ;;  %377 = vperm.xlu2 %606, %v744_v15   ;;  %374 = vperm.xlu1 %605, %v749_v16   ;;  %v170_v41 = vpop.permute.xlu0 %169  ;;  %v933_v16 = vld [vmem:[%s1247_s3] ss:$0 sm:$0xff]  ;;  %s639_s3 = smov [#allocation2]  }
  0x76   :  { %389 = vperm.xlu0 %604, %v769_v20   ;;  %v217_v15 = vsub.s32 %v170_v41, %v910_v4  ;;  %v249_v20 = vsub.s32 0, %v222_v14  ;;  %s559_s30 = sshll.u32 %s639_s3, 4  ;;  %s560_s30 = int_to_ptr.vmem [resolvable:$true] %s559_s30 }
  0x78   :  { %v234_v24 = vsub.s32 0, %v217_v15  ;;  %vm233_vm9 = vcmp.lt.s32.totalorder %v217_v15, 0  ;;  %v962_v32 = vsel %vm248_vm6, %v249_v20, %v222_v14 }
  0x7a   :  { %v235_v34 = vsel %vm233_vm9, %v234_v24, %v217_v15 }
  0x7b   :  { %vm459_vm13 = vcmp.ge.s32.totalorder %v235_v34, 5 }
  0x7c   :  { %v866_v42 = vpop.permute.xlu2 %211 }
  0x7d   :  { %v868_v43 = vpop.permute.xlu1 %178  ;;  %386 = vperm.xlu2 %606, %v774_v21   ;;  %383 = vperm.xlu1 %605, %v779_v22   ;;  %v173_v44 = vpop.permute.xlu0 %172  ;;  %v219_v21 = vsub.s32 %v176_v40, %v910_v4  ;;  %v225_v40 = vsub.s32 %v856_v38, %v910_v4 }
  0x7e   :  { %v218_v17 = vsub.s32 %v173_v44, %v910_v4 }
  0x7f   :  { %v240_v33 = vsub.s32 0, %v219_v21 }
  0x80   :  { %v237_v30 = vsub.s32 0, %v218_v17  ;;  %vm236_vm1 = vcmp.lt.s32.totalorder %v218_v17, 0 }
  0x82   :  { %v238_v41 = vsel %vm236_vm1, %v237_v30, %v218_v17 }
  0x84   :  { %v101_v63 = vpop.f32.mrf.mxu0 }
  0x85   :  { %v872_v45 = vpop.permute.xlu1 %190  ;;  %392 = vperm.xlu1 %605, %v795_v25   ;;  %v875_v46 = vpop.permute.xlu0 %187  ;;  %vm427_vm14 = vcmp.lt.f32.partialorder %v101_v63, 25.0 }
  0x86   :  { %v877_v47 = vpop.permute.xlu2 %285  ;;  %v113_v0 = vpop.f32.mrf.mxu1  ;;  %v223_v20 = vsub.s32 %v875_v46, %v910_v4 }
  0x87   :  { %vm431_vm7 = vcmp.lt.f32.partialorder %v113_v0, 25.0  ;;  %v220_v0 = vsub.s32 %v868_v43, %v910_v4 }
  0x88   :  { %v252_v37 = vsub.s32 0, %v223_v20 }
  0x89   :  { %v243_v14 = vsub.s32 0, %v220_v0 }
  0x8c   :  { %v912_v5 = vpop.f32.mrf.mxu0 }
  0x8d   :  { %v879_v48 = vpop.permute.xlu1 %199  ;;  %v881_v49 = vpop.permute.xlu0 %196 }
  0x8e   :  { %v295_v50 = vpop.permute.xlu2 %294  ;;  %v914_v6 = vpop.f32.mrf.mxu1  ;;  %v227_v8 = vsub.s32 %v879_v48, %v910_v4 }
  0x8f   :  { %v921_v11 = vpop.f32.mrf.mxu2  ;;  %vm334_vm5 = vcmp.eq.s32.totalorder %v295_v50, %v933_v16 }
  0x91   :  { %v1093_v35 = vpop.f32.mrf.mxu3 }
  0x94   :  { %v107_v22 = vpop.f32.mrf.mxu0 }
  0x95   :  { %v883_v51 = vpop.permute.xlu1 %208  ;;  %v885_v52 = vpop.permute.xlu0 %205  ;;  %vm429_vm15 = vcmp.lt.f32.partialorder %v107_v22, 25.0 }
  0x96   :  { %v887_v53 = vpop.permute.xlu2 %300  ;;  %v956_v29 = vpop.f32.mrf.mxu1 }
  0x97   :  { %v959_v31 = vpop.f32.mrf.mxu2 }
  0x9c   :  { %v110_v30 = vpop.f32.mrf.mxu0 }
  0x9d   :  { %v889_v54 = vpop.permute.xlu0 %214 }
  0x9e   :  { %v891_v55 = vpop.permute.xlu2 %309  ;;  %v283_v56 = vpop.permute.xlu1 %282 }
  0x9f   :  { %vm330_vm10 = vcmp.eq.s32.totalorder %v283_v56, %v933_v16  ;;  %v131_v13 = vpop.f32.mrf.mxu2 }
  0xa6   :  { %v893_v57 = vpop.permute.xlu2 %318  ;;  %v895_v58 = vpop.permute.xlu1 %291 }
  0xa7   :  { %v289_v59 = vpop.permute.xlu0 %288 }
  0xa8   :  { %vm332_vm3 = vcmp.eq.s32.totalorder %v289_v59, %v933_v16 }
  0xae   :  { %v897_v60 = vpop.permute.xlu2 %327  ;;  %v899_v61 = vpop.permute.xlu1 %297 }
  0xaf   :  { %v901_v62 = vpop.permute.xlu0 %303 }
  0xb6   :  { %v903_v1 = vpop.permute.xlu1 %306 }
  0xb7   :  { %v905_v2 = vpop.permute.xlu0 %312  ;;  %v354_v3 = vpop.permute.xlu2 %353 }
  0xb8   :  { %vm397_vm4 = vcmp.ne.s32.totalorder %v354_v3, %v926_v12  ;;  %v224_v3 = vsub.s32 %v872_v45, %v910_v4  ;;  %v1027_v45 = vsub.s32 %v861_v39, %v910_v4 }
  0xb9   :  { %vm952_vm11 = vmand %vm332_vm3, %vm397_vm4  ;;  %vm239_vm3 = vcmp.lt.s32.totalorder %v219_v21, 0 }
  0xba   :  { %v991_v50 = vsel %vm239_vm3, %v240_v33, %v219_v21  ;;  %v255_v15 = vsub.s32 0, %v224_v3 }
  0xbe   :  { %v916_v7 = vpop.permute.xlu1 %315 }
  0xbf   :  { %v919_v9 = vpop.permute.xlu0 %321  ;;  %v360_v10 = vpop.permute.xlu2 %359 }
  0xc0   :  { %vm399_vm2 = vcmp.ne.s32.totalorder %v360_v10, %v926_v12  ;;  %v258_v10 = vsub.s32 0, %v225_v40 }
  0xc1   :  { %vm943_vm8 = vmand %vm334_vm5, %vm399_vm2 }
  0xc2   :  { %vm447_vm2 = vmand %vm943_vm8, %vm431_vm7  ;;  %vm496_vm7 = vcmp.gt.s32.totalorder %v962_v32, 0  ;;  %vm337_vm8 = vcmp.eq.s32.totalorder %v901_v62, %v933_v16 }
  0xc3   :  { %vm971_vm5 = vmand %vm952_vm11, %vm429_vm15  ;;  %vm491_vm11 = vcmp.gt.s32.totalorder %v235_v34, 0  ;;  %vm428_vm15 = vcmp.lt.f32.partialorder %v912_v5, 25.0  ;;  %v512_v43 = vsel %vm496_vm7, 1, %v637_v26 }
  0xc4   :  { %v507_v48 = vsel %vm491_vm11, 1, %v637_v26 }
  0xc6   :  { %v939_v18 = vpop.permute.xlu1 %324 }
  0xc7   :  { %v369_v23 = vpop.permute.xlu2 %368 }
  0xc8   :  { %v348_v27 = vpop.permute.xlu0 %347  ;;  %vm402_vm4 = vcmp.ne.s32.totalorder %v369_v23, %v926_v12 }
  0xc9   :  { %vm395_vm12 = vcmp.ne.s32.totalorder %v348_v27, %v926_v12 }
  0xca   :  { %vm411_vm0 = vmand %vm330_vm10, %vm395_vm12  ;;  %vm463_vm10 = vcmp.ge.s32.totalorder %v247_v19, 5 }
  0xcb   :  { %vm978_vm6 = vmand %vm411_vm0, %vm427_vm14  ;;  %vm340_vm0 = vcmp.eq.s32.totalorder %v905_v2, %v933_v16  ;;  %v1263_v2 = vmov 0 }
  0xcc   :  { %vm987_vm9 = vmand %vm447_vm2, %vm463_vm10  ;;  %vm331_vm10 = vcmp.eq.s32.totalorder %v877_v47, %v933_v16  ;;  %v122_v47 = vpop.f32.mrf.mxu1 }
  0xcd   :  { %vm993_vm12 = vmand %vm337_vm8, %vm402_vm4  ;;  %vm492_vm4 = vcmp.gt.s32.totalorder %v238_v41, 0  ;;  %v527_v46 = vsel %vm987_vm9, %v976_v36, 4294967295 }
  0xce   :  { %vm1003_vm1 = vmand %vm978_vm6, %vm459_vm13  ;;  %vm460_vm6 = vcmp.ge.s32.totalorder %v238_v41, 5  ;;  %v508_v39 = vsel %vm492_vm4, 1, %v637_v26  ;;  %vm263_vm4 = vcmp.lt.s32.totalorder %v227_v8, 0 }
  0xcf   :  { %v378_v59 = vpop.permute.xlu2 %377  ;;  %v351_v63 = vpop.permute.xlu1 %350  ;;  %v523_v5 = vsel %vm1003_vm1, %v507_v48, 4294967295 }
  0xd0   :  { %vm405_vm2 = vcmp.ne.s32.totalorder %v378_v59, %v926_v12  ;;  %vm396_vm3 = vcmp.ne.s32.totalorder %v351_v63, %v926_v12  ;;  %v363_v62 = vpop.permute.xlu0 %362  ;;  %v140_v48 = vpop.f32.mrf.mxu3 }
  0xd1   :  { %vm1015_vm8 = vmand %vm340_vm0, %vm405_vm2  ;;  %vm400_vm14 = vcmp.ne.s32.totalorder %v363_v62, %v926_v12  ;;  %vm432_vm0 = vcmp.lt.f32.partialorder %v914_v6, 25.0  ;;  %v1268_v6 = vmov 0 }
  0xd2   :  { %v1264_v2 = vsel %vm1015_vm8, 4294967295, %v1263_v2  ;;  %vm412_vm13 = vmand %vm331_vm10, %vm396_vm3  ;;  %vm335_vm3 = vcmp.eq.s32.totalorder %v899_v61, %v933_v16  ;;  %v264_v61 = vsub.s32 0, %v227_v8  ;;  %vm434_vm10 = vcmp.lt.f32.partialorder %v122_v47, 25.0 }
  0xd3   :  { %vm444_vm2 = vmand %vm412_vm13, %vm428_vm15  ;;  %vm254_vm13 = vcmp.lt.s32.totalorder %v224_v3, 0  ;;  %vm1266_vm8 = vcmp.lt.s32.totalorder %v225_v40, 0 }
  0xd4   :  { %vm476_vm7 = vmand %vm444_vm2, %vm460_vm6  ;;  %vm242_vm6 = vcmp.lt.s32.totalorder %v220_v0, 0  ;;  %vm1265_vm2 = vcmp.ge.s32.totalorder %v962_v32, 5  ;;  %v1052_v22 = vsel %vm1266_vm8, %v258_v10, %v225_v40  ;;  %v1068_v25 = vsel %vm254_vm13, %v255_v15, %v224_v3 }
  0xd5   :  { %v524_v17 = vsel %vm476_vm7, %v508_v39, 4294967295  ;;  %vm416_vm15 = vmand %vm335_vm3, %vm400_vm14  ;;  %vm437_vm7 = vcmp.lt.f32.partialorder %v131_v13, 25.0  ;;  %vm1267_vm14 = vcmp.ge.s32.totalorder %v991_v50, 5  ;;  %v267_v32 = vsub.s32 0, %v1027_v45 }
  0xd6   :  { %v1043_v19 = vpack.c.b16 %v524_v17, %v523_v5  ;;  %vm448_vm11 = vmand %vm416_vm15, %vm432_vm0  ;;  %vm333_vm8 = vcmp.eq.s32.totalorder %v895_v58, %v933_v16  ;;  %v1084_v33 = vsel %vm263_vm4, %v264_v61, %v227_v8  ;;  %vm1272_vm13 = vnez %v1264_v2 }
  0xd7   :  { %vm480_vm1 = vmand %vm448_vm11, %vm1265_vm2  ;;  %v357_v21 = vpop.permute.xlu1 %356  ;;  %v244_v36 = vsel %vm242_vm6, %v243_v14, %v220_v0  ;;  %v226_v40 = vsub.s32 %v881_v49, %v910_v4  ;;  %vm435_vm11 = vcmp.lt.f32.partialorder %v921_v11, 25.0  ;;  %v387_v58 = vpop.permute.xlu2 %386  ;;  %vm251_vm2 = vcmp.lt.s32.totalorder %v223_v20, 0 }
  0xd8   :  { %vm1058_vm3 = vmand %vm971_vm5, %vm1267_vm14  ;;  %v528_v23 = vsel %vm480_vm1, %v512_v43, 4294967295  ;;  %vm398_vm0 = vcmp.ne.s32.totalorder %v357_v21, %v926_v12  ;;  %v372_v24 = vpop.permute.xlu0 %371  ;;  %vm493_vm1 = vcmp.gt.s32.totalorder %v991_v50, 0  ;;  %vm466_vm6 = vcmp.ge.s32.totalorder %v1068_v25, 5 }
  0xd9   :  { %v1269_v6 = vsel %vm1058_vm3, 4294967295, %v1268_v6  ;;  %vm1073_vm5 = vmand %vm993_vm12, %vm434_vm10  ;;  %v1077_v28 = vpack.c.b16 %v528_v23, %v527_v46  ;;  %vm403_vm9 = vcmp.ne.s32.totalorder %v372_v24, %v926_v12  ;;  %vm338_vm10 = vcmp.eq.s32.totalorder %v903_v1, %v933_v16 }
  0xda   :  { %vm1089_vm12 = vmand %vm1272_vm13, %vm437_vm7  ;;  %vm430_vm14 = vcmp.lt.f32.partialorder %v110_v30, 25.0  ;;  %vm408_vm3 = vcmp.ne.s32.totalorder %v387_v58, %v926_v12  ;;  %v253_v50 = vsel %vm251_vm2, %v252_v37, %v223_v20  ;;  %v261_v56 = vsub.s32 0, %v226_v40 }
  0xdb   :  { %vm1103_vm4 = vmand %vm333_vm8, %vm398_vm0  ;;  %vm469_vm0 = vcmp.ge.s32.totalorder %v1084_v33, 5  ;;  %vm494_vm8 = vcmp.gt.s32.totalorder %v244_v36, 0  ;;  %v509_v59 = vsel %vm493_vm1, 1, %v637_v26  ;;  %vm1284_vm1 = vnez %v1269_v6 }
  0xdc   :  { %vm419_vm7 = vmand %vm338_vm10, %vm403_vm9  ;;  %vm260_vm9 = vcmp.lt.s32.totalorder %v226_v40, 0  ;;  %v510_v38 = vsel %vm494_vm8, 1, %v637_v26  ;;  %v525_v0 = vsel %vm1284_vm1, %v509_v59, 4294967295  ;;  %vm336_vm8 = vcmp.eq.s32.totalorder %v887_v53, %v933_v16 }
  0xdd   :  { %vm1113_vm13 = vmand %vm1073_vm5, %vm466_vm6  ;;  %vm1283_vm5 = vcmp.lt.s32.totalorder %v1027_v45, 0  ;;  %vm462_vm6 = vcmp.ge.s32.totalorder %v244_v36, 5  ;;  %v262_v10 = vsel %vm260_vm9, %v261_v56, %v226_v40  ;;  %v229_v53 = vsub.s32 %v885_v52, %v910_v4 }
  0xde   :  { %vm1120_vm15 = vmand %vm1089_vm12, %vm469_vm0  ;;  %v268_v44 = vsel %vm1283_vm5, %v267_v32, %v1027_v45  ;;  %vm1287_vm0 = vcmp.ge.s32.totalorder %v1052_v22, 5  ;;  %v230_v45 = vsub.s32 %v883_v51, %v910_v4  ;;  %vm341_vm5 = vcmp.eq.s32.totalorder %v916_v7, %v933_v16 }
  0xdf   :  { %vm1126_vm10 = vmand %vm419_vm7, %vm435_vm11  ;;  %v366_v63 = vpop.permute.xlu1 %365  ;;  %vm343_vm11 = vcmp.eq.s32.totalorder %v919_v9, %v933_v16  ;;  %v134_v9 = vpop.f32.mrf.mxu2  ;;  %v270_v17 = vsub.s32 0, %v229_v53 }
  0xe0   :  { %vm446_vm12 = vmand %vm1103_vm4, %vm430_vm14  ;;  %vm401_vm2 = vcmp.ne.s32.totalorder %v366_v63, %v926_v12  ;;  %v381_v62 = vpop.permute.xlu0 %380  ;;  %vm433_vm4 = vcmp.lt.f32.partialorder %v956_v29, 25.0  ;;  %v273_v7 = vsub.s32 0, %v230_v45 }
  0xe1   :  { %vm478_vm7 = vmand %vm446_vm12, %vm462_vm6  ;;  %vm497_vm12 = vcmp.gt.s32.totalorder %v253_v50, 0  ;;  %vm498_vm6 = vcmp.gt.s32.totalorder %v1068_v25, 0 }
  0xe2   :  { %vm1147_vm14 = vmand %vm343_vm11, %vm408_vm3  ;;  %v526_v2 = vsel %vm478_vm7, %v510_v38, 4294967295  ;;  %vm465_vm11 = vcmp.ge.s32.totalorder %v253_v50, 5  ;;  %v514_v51 = vsel %vm498_vm6, 1, %v637_v26  ;;  %v513_v39 = vsel %vm497_vm12, 1, %v637_v26 }
  0xe3   :  { %vm1158_vm1 = vmand %vm1126_vm10, %vm1287_vm0  ;;  %v540_v43 = vpack.c.b16 %v526_v2, %v525_v0  ;;  %vm438_vm0 = vcmp.lt.f32.partialorder %v134_v9, 25.0  ;;  %vm500_vm7 = vcmp.gt.s32.totalorder %v262_v10, 0  ;;  %v530_v52 = vsel %vm1113_vm13, %v514_v51, 4294967295 }
  0xe4   :  { %vm417_vm3 = vmand %vm336_vm8, %vm401_vm2  ;;  %vm470_vm8 = vcmp.ge.s32.totalorder %v268_v44, 5  ;;  %vm1290_vm10 = vcmp.ne.s32.totalorder %v381_v62, %v926_v12  ;;  %vm436_vm6 = vcmp.lt.f32.partialorder %v959_v31, 25.0  ;;  %vm272_vm13 = vcmp.lt.s32.totalorder %v230_v45, 0 }
  0xe5   :  { %v541_v47 = vpack.c.b8 %v540_v43, %v1043_v19  ;;  %vm449_vm9 = vmand %vm417_vm3, %vm433_vm4  ;;  %vm1291_vm3 = vcmp.gt.s32.totalorder %v268_v44, 0  ;;  %v274_v23 = vsel %vm272_vm13, %v273_v7, %v230_v45  ;;  %v516_v24 = vsel %vm500_vm7, 1, %v637_v26 }
  0xe6   :  { %vm481_vm2 = vmand %vm449_vm9, %vm465_vm11  ;;  %v518_v29 = vsel %vm1291_vm3, 1, %v637_v26  ;;  %vm1292_vm11 = vcmp.gt.s32.totalorder %v1084_v33, 0  ;;  %vm339_vm9 = vcmp.eq.s32.totalorder %v891_v55, %v933_v16  ;;  %v231_v55 = vsub.s32 %v866_v42, %v910_v4  ;;  %v143_v42 = vpop.f32.mrf.mxu3 }
  0xe7   :  { %551 = vst [vmem:[#allocation2] sm:$0xff] %v541_v47  ;;  %v529_v13 = vsel %vm481_vm2, %v513_v39, 4294967295  ;;  %vm422_vm4 = vmand %vm341_vm5, %vm1290_vm10  ;;  %v517_v14 = vsel %vm1292_vm11, 1, %v637_v26  ;;  %v375_v5 = vpop.permute.xlu1 %374  ;;  %vm440_vm2 = vcmp.lt.f32.partialorder %v140_v48, 25.0  ;;  %vm269_vm11 = vcmp.lt.s32.totalorder %v229_v53, 0 }
  0xe8   :  { %v543_v15 = vpack.c.b16 %v530_v52, %v529_v13  ;;  %vm454_vm12 = vmand %vm422_vm4, %vm438_vm0  ;;  %vm404_vm10 = vcmp.ne.s32.totalorder %v375_v5, %v926_v12  ;;  %v533_v61 = vsel %vm1120_vm15, %v517_v14, 4294967295  ;;  %vm468_vm4 = vcmp.ge.s32.totalorder %v262_v10, 5  ;;  %v390_v6 = vpop.permute.xlu0 %389 }
  0xe9   :  { %vm486_vm5 = vmand %vm454_vm12, %vm470_vm8  ;;  %vm1293_vm8 = vcmp.gt.s32.totalorder %v1052_v22, 0  ;;  %v271_v27 = vsel %vm269_vm11, %v270_v17, %v229_v53  ;;  %v232_v22 = vsub.s32 %v889_v54, %v910_v4  ;;  %vm409_vm12 = vcmp.ne.s32.totalorder %v390_v6, %v926_v12 }
  0xea   :  { %v544_v19 = vpack.c.b8 %v543_v15, %v1077_v28  ;;  %v534_v20 = vsel %vm486_vm5, %v518_v29, 4294967295  ;;  %vm420_vm3 = vmand %vm339_vm9, %vm404_vm10  ;;  %v515_v46 = vsel %vm1293_vm8, 1, %v637_v26  ;;  %vm472_vm13 = vcmp.ge.s32.totalorder %v274_v23, 5 }
  0xeb   :  { %v546_v21 = vpack.c.b16 %v534_v20, %v533_v61  ;;  %vm452_vm0 = vmand %vm420_vm3, %vm436_vm6  ;;  %v531_v31 = vsel %vm1158_vm1, %v515_v46, 4294967295  ;;  %v276_v30 = vsub.s32 0, %v231_v55  ;;  %vm344_vm7 = vcmp.eq.s32.totalorder %v939_v18, %v933_v16 }
  0xec   :  { %552 = vst [vmem:[#allocation2 + $0x8] sm:$0xff] %v544_v19  ;;  %vm484_vm15 = vmand %vm452_vm0, %vm468_vm4  ;;  %vm342_vm1 = vcmp.eq.s32.totalorder %v893_v57, %v933_v16  ;;  %vm504_vm5 = vcmp.gt.s32.totalorder %v274_v23, 0  ;;  %vm275_vm3 = vcmp.lt.s32.totalorder %v231_v55, 0  ;;  %v279_v4 = vsub.s32 0, %v232_v22 }
  0xed   :  { %vm456_vm6 = vmand %vm1147_vm14, %vm440_vm2  ;;  %v532_v25 = vsel %vm484_vm15, %v516_v24, 4294967295  ;;  %vm503_vm14 = vcmp.gt.s32.totalorder %v271_v27, 0  ;;  %vm439_vm11 = vcmp.lt.f32.partialorder %v1093_v35, 25.0  ;;  %vm278_vm4 = vcmp.lt.s32.totalorder %v232_v22, 0 }
  0xee   :  { %v545_v28 = vpack.c.b16 %v532_v25, %v531_v31  ;;  %vm1217_vm9 = vmand %vm456_vm6, %vm472_vm13  ;;  %vm441_vm8 = vcmp.lt.f32.partialorder %v143_v42, 25.0  ;;  %vm471_vm6 = vcmp.ge.s32.totalorder %v271_v27, 5  ;;  %v520_v18 = vsel %vm504_vm5, 1, %v637_v26  ;;  %v146_v58 = vpop.f32.mrf.mxu3 }
  0xef   :  { %v384_v34 = vpop.permute.xlu1 %383  ;;  %vm1223_vm10 = vmand %vm344_vm7, %vm409_vm12  ;;  %v519_v57 = vsel %vm503_vm14, 1, %v637_v26  ;;  %v536_v36 = vsel %vm1217_vm9, %v520_v18, 4294967295  ;;  %v277_v37 = vsel %vm275_vm3, %v276_v30, %v231_v55  ;;  %v280_v41 = vsel %vm278_vm4, %v279_v4, %v232_v22 }
  0xf0   :  { %v547_v33 = vpack.c.b8 %v546_v21, %v545_v28  ;;  %vm407_vm2 = vcmp.ne.s32.totalorder %v384_v34, %v926_v12  ;;  %vm457_vm12 = vmand %vm1223_vm10, %vm441_vm8  ;;  %vm473_vm7 = vcmp.ge.s32.totalorder %v277_v37, 5  ;;  %vm345_vm5 = vcmp.eq.s32.totalorder %v897_v60, %v933_v16 }
  0xf1   :  { %vm423_vm0 = vmand %vm342_vm1, %vm407_vm2  ;;  %vm442_vm1 = vcmp.lt.f32.partialorder %v146_v58, 25.0 }
  0xf2   :  { %553 = vst [vmem:[#allocation2 + $0x10] sm:$0xff] %v547_v33  ;;  %vm455_vm15 = vmand %vm423_vm0, %vm439_vm11  ;;  %vm505_vm11 = vcmp.gt.s32.totalorder %v277_v37, 0  ;;  %vm506_vm0 = vcmp.gt.s32.totalorder %v280_v41, 0 }
  0xf3   :  { %vm487_vm13 = vmand %vm455_vm15, %vm471_vm6  ;;  %vm474_vm15 = vcmp.ge.s32.totalorder %v280_v41, 5  ;;  %v521_v1 = vsel %vm505_vm11, 1, %v637_v26  ;;  %v522_v11 = vsel %vm506_vm0, 1, %v637_v26 }
  0xf4   :  { %v535_v40 = vsel %vm487_vm13, %v519_v57, 4294967295  ;;  %vm489_vm2 = vmand %vm457_vm12, %vm473_vm7 }
  0xf5   :  { %v548_v35 = vpack.c.b16 %v536_v36, %v535_v40  ;;  %v537_v60 = vsel %vm489_vm2, %v521_v1, 4294967295 }
  0xf7   :  { %v393_v49 = vpop.permute.xlu1 %392 }
  0xf8   :  { %vm410_vm14 = vcmp.ne.s32.totalorder %v393_v49, %v926_v12 }
  0xf9   :  { %vm426_vm9 = vmand %vm345_vm5, %vm410_vm14 }
  0xfa   :  { %vm458_vm3 = vmand %vm426_vm9, %vm442_vm1 }
  0xfb   :  { %vm490_vm6 = vmand %vm458_vm3, %vm474_vm15 }
  0xfc   :  { %v538_v16 = vsel %vm490_vm6, %v522_v11, 4294967295 }
  0xfd   :  { %v549_v44 = vpack.c.b16 %v538_v16, %v537_v60 }
  0xff   :  { %v550_v12 = vpack.c.b8 %v549_v44, %v548_v35 }
 0x101   :  { %554 = vst [vmem:[#allocation2 + $0x18] sm:$0xff] %v550_v12 }
 0x102   :  { %567 = dma.vmem_to_hbm [thread:$0]  %s560_s30, 512, %s562_s7, [#allocation3], %s640_s8, %s640_s8, %s641_s9  }
 0x103   :  { %634 = dma.done.wait [#allocation3], 512  }
 0x104   :  { %635 = vsyncadd [#allocation3], 4294966784 }
 0x105   :  { %572 = vsyncpa [#allocation3], 1 }

</bundles_post_ra>
